<compile_context>
chip_gen: v5e
topology: v5e:2x2
jax: 0.10.0
libtpu: 0.0.40
codegen_flags: <defaults>
</compile_context>

<pallas_src>
import functools

import jax
import jax.numpy as jnp
from jax.experimental import pallas as pl
from jax.experimental.pallas import tpu as pltpu


def _conv1x1_bn_kernel(x_ref, w_ref, scale_ref, bias_ref, o_ref):
    # x_ref:     (Cin, THW)  one image's channel-major pixel tile
    # w_ref:     (Cout, Cin) 1x1-conv weight as a matmul matrix
    # scale_ref: (Cout, 1)   folded BN scale
    # bias_ref:  (Cout, 1)   folded BN bias
    # o_ref:     (Cout, THW) lane-dense output tile
    y = jnp.dot(w_ref[...], x_ref[...], preferred_element_type=jnp.float32)
    y = y * scale_ref[...] + bias_ref[...]          # f32 epilogue (v5e-safe)
    o_ref[...] = y.astype(o_ref.dtype)


def conv1x1_bn_nchw(x3, w, scale, bias, *, max_tile=1024,
                    compute_dtype=None, out_dtype=None):
    """Fused 1x1-conv + BN on NCHW-flattened input.

    x3: (N, Cin, HW); w: (Cout, Cin); scale/bias: (Cout, 1) -> (N, Cout, HW).
    """
    N, Cin, HW = x3.shape
    Cout = w.shape[0]
    out_dtype = out_dtype or x3.dtype

    if compute_dtype is not None and compute_dtype != x3.dtype:
        # Optional narrow-operand path (bf16 on v6e/v7x): halves HBM read
        # bytes; accumulation and BN epilogue stay f32 inside the kernel.
        x3 = x3.astype(compute_dtype)
        w = w.astype(compute_dtype)

    # Lane-dim tile: use the full HW when it fits one block (no pad needed),
    # otherwise a multiple-of-128 tile; the ragged last block is masked by
    # Pallas, which is correct here because the op is pointwise along HW.
    thw = HW if HW <= max_tile else max_tile
    grid = (N, pl.cdiv(HW, thw))

    return pl.pallas_call(
        _conv1x1_bn_kernel,
        out_shape=jax.ShapeDtypeStruct((N, Cout, HW), out_dtype),
        grid_spec=pltpu.PrefetchScalarGridSpec(
            num_scalar_prefetch=0,
            grid=grid,
            in_specs=[
                pl.BlockSpec((None, Cin, thw), lambda n, t: (n, 0, t)),
                pl.BlockSpec((Cout, Cin), lambda n, t: (0, 0)),
                pl.BlockSpec((Cout, 1), lambda n, t: (0, 0)),
                pl.BlockSpec((Cout, 1), lambda n, t: (0, 0)),
            ],
            out_specs=pl.BlockSpec((None, Cout, thw), lambda n, t: (n, 0, t)),
        ),
        compiler_params=pltpu.CompilerParams(
            dimension_semantics=("parallel", "parallel"),
            vmem_limit_bytes=32 * 1024 * 1024,
        ),
    )(x3, w, scale, bias)


class ResDownSPallas:
    """ResDownS: Conv2d(inplane, outplane, k=1, bias=False) + BatchNorm2d(outplane),
    then center-crop [4:-4, 4:-4] when the spatial width < 20."""

    def __init__(self, inplane, outplane, key):
        self.inplane = inplane
        self.outplane = outplane
        k_w, k_g, k_b, k_m, k_v = jax.random.split(key, 5)
        # Conv weight: PyTorch shape (Cout, Cin, 1, 1) -> (Cout, Cin).
        w4 = jax.random.normal(k_w, (outplane, inplane, 1, 1), jnp.float32) * 0.1
        self.w = w4[:, :, 0, 0]                              # (Cout, Cin)
        # BatchNorm parameters / running stats (deterministic, eval mode).
        # TODO(synk): BatchNorm2d training-mode batch statistics are not
        # implemented; this is inference (running-stats) semantics only.
        gamma = 1.0 + 0.1 * jax.random.normal(k_g, (outplane,), jnp.float32)
        beta = 0.1 * jax.random.normal(k_b, (outplane,), jnp.float32)
        running_mean = 0.1 * jax.random.normal(k_m, (outplane,), jnp.float32)
        running_var = jnp.abs(
            1.0 + 0.1 * jax.random.normal(k_v, (outplane,), jnp.float32))
        eps = 1e-5
        scale = gamma / jnp.sqrt(running_var + eps)
        bias = beta - running_mean * scale
        self.scale = scale.reshape(outplane, 1)              # (Cout, 1)
        self.bias = bias.reshape(outplane, 1)                # (Cout, 1)

    @functools.partial(jax.jit, static_argnums=0)
    def __call__(self, x):
        # x: (N, Cin, H, W) float32 (NCHW, like PyTorch)
        N, Cin, H, W = x.shape
        assert Cin == self.inplane
        # Crop hoisted before the pointwise conv+BN (mathematically identical
        # to PyTorch's crop-after-conv; 1x1 conv preserves spatial size so the
        # W<20 condition is the same).
        if W < 20:
            x = x[:, :, 4:-4, 4:-4]
            H, W = H - 8, W - 8
        x3 = x.reshape(N, Cin, H * W)      # free: merges contiguous H, W dims
        y3 = conv1x1_bn_nchw(x3, self.w, self.scale, self.bias)
        return y3.reshape(N, self.outplane, H, W)


if __name__ == "__main__":
    key = jax.random.PRNGKey(0)
    k_param, k_x = jax.random.split(key)

    inplane, outplane = 4, 8
    N, H, W = 2, 16, 16

    module = ResDownSPallas(inplane, outplane, k_param)
    x = jax.random.normal(k_x, (N, inplane, H, W), jnp.float32)

    out = jax.block_until_ready(module(x))

    # Plain-JAX reference with PyTorch ordering: 1x1 conv + BN, then crop.
    ref = jnp.einsum("nchw,oc->nohw", x, module.w)
    ref = ref * module.scale.reshape(1, outplane, 1, 1) \
          + module.bias.reshape(1, outplane, 1, 1)
    ref = ref[:, :, 4:-4, 4:-4]

    assert out.shape == (N, outplane, H - 8, W - 8), out.shape
    assert jnp.allclose(out, ref, atol=1e-5, rtol=1e-5), "mismatch vs reference"

    print("KERNEL_OK")
</pallas_src>

<mosaic_0001>
module attributes {stable_mosaic.version = 11 : i64} {
  func.func @_conv1x1_bn_kernel(%arg0: i32, %arg1: i32, %arg2: memref<1x4x64xf32, #tpu.memory_space<vmem>>, %arg3: memref<8x4xf32, #tpu.memory_space<vmem>>, %arg4: memref<8x1xf32, #tpu.memory_space<vmem>>, %arg5: memref<8x1xf32, #tpu.memory_space<vmem>>, %arg6: memref<1x8x64xf32, #tpu.memory_space<vmem>>) attributes {dimension_semantics = [#tpu.dimension_semantics<parallel>, #tpu.dimension_semantics<parallel>], iteration_bounds = array<i64: 2, 1>, scalar_prefetch = 0 : i64, scratch_operands = 0 : i64, tpu.core_type = #tpu.core_type<tc>, window_params = [{transform_indices = @transform_0, window_bounds = array<i64: 1, 4, 64>}, {pipeline_mode = #tpu.pipeline_mode<synchronous>, transform_indices = @transform_1, window_bounds = array<i64: 8, 4>}, {pipeline_mode = #tpu.pipeline_mode<synchronous>, transform_indices = @transform_2, window_bounds = array<i64: 8, 1>}, {pipeline_mode = #tpu.pipeline_mode<synchronous>, transform_indices = @transform_3, window_bounds = array<i64: 8, 1>}, {transform_indices = @transform_4, window_bounds = array<i64: 1, 8, 64>}]} {
    %c0 = arith.constant 0 : index
    %c0_0 = arith.constant 0 : index
    %0 = vector.load %arg3[%c0, %c0_0] : memref<8x4xf32, #tpu.memory_space<vmem>>, vector<8x4xf32>
    %c0_1 = arith.constant 0 : index
    %c0_2 = arith.constant 0 : index
    %c0_3 = arith.constant 0 : index
    %1 = vector.load %arg2[%c0_1, %c0_2, %c0_3] : memref<1x4x64xf32, #tpu.memory_space<vmem>>, vector<1x4x64xf32>
    %2 = vector.shape_cast %1 : vector<1x4x64xf32> to vector<4x64xf32>
    %cst = arith.constant dense<0.000000e+00> : vector<8x64xf32>
    %3 = tpu.matmul %0, %2, %cst {dimension_numbers = #tpu.dot_dimension_numbers<[1], [0], [0], [1], [0, 0, 1, 1], [], []>} : vector<8x4xf32>, vector<4x64xf32>, vector<8x64xf32> -> vector<8x64xf32>
    %c0_4 = arith.constant 0 : index
    %c0_5 = arith.constant 0 : index
    %4 = vector.load %arg4[%c0_4, %c0_5] : memref<8x1xf32, #tpu.memory_space<vmem>>, vector<8x1xf32>
    %5 = vector.broadcast %4 : vector<8x1xf32> to vector<8x64xf32>
    %6 = arith.mulf %3, %5 : vector<8x64xf32>
    %c0_6 = arith.constant 0 : index
    %c0_7 = arith.constant 0 : index
    %7 = vector.load %arg5[%c0_6, %c0_7] : memref<8x1xf32, #tpu.memory_space<vmem>>, vector<8x1xf32>
    %8 = vector.broadcast %7 : vector<8x1xf32> to vector<8x64xf32>
    %9 = arith.addf %6, %8 : vector<8x64xf32>
    %c0_8 = arith.constant 0 : index
    %c0_9 = arith.constant 0 : index
    %c0_10 = arith.constant 0 : index
    %10 = vector.load %arg6[%c0_8, %c0_9, %c0_10] : memref<1x8x64xf32, #tpu.memory_space<vmem>>, vector<1x8x64xf32>
    %11 = vector.shape_cast %10 : vector<1x8x64xf32> to vector<8x64xf32>
    %12 = vector.shape_cast %9 : vector<8x64xf32> to vector<1x8x64xf32>
    tpu.vector_store %arg6[%c0_8, %c0_9, %c0_10], %12 {strides = array<i32>} : memref<1x8x64xf32, #tpu.memory_space<vmem>>, vector<1x8x64xf32>,
    return
  }
  func.func @transform_0(%arg0: i32, %arg1: i32) -> (i32, i32, i32) {
    %c0_i32 = arith.constant 0 : i32
    %c0_i32_0 = arith.constant 0 : i32
    return %arg0, %c0_i32, %arg1 : i32, i32, i32
  }
  func.func @transform_1(%arg0: i32, %arg1: i32) -> (i32, i32) {
    %c0_i32 = arith.constant 0 : i32
    %c0_i32_0 = arith.constant 0 : i32
    %c0_i32_1 = arith.constant 0 : i32
    return %c0_i32, %c0_i32_0 : i32, i32
  }
  func.func @transform_2(%arg0: i32, %arg1: i32) -> (i32, i32) {
    %c0_i32 = arith.constant 0 : i32
    %c0_i32_0 = arith.constant 0 : i32
    %c0_i32_1 = arith.constant 0 : i32
    return %c0_i32, %c0_i32_0 : i32, i32
  }
  func.func @transform_3(%arg0: i32, %arg1: i32) -> (i32, i32) {
    %c0_i32 = arith.constant 0 : i32
    %c0_i32_0 = arith.constant 0 : i32
    %c0_i32_1 = arith.constant 0 : i32
    return %c0_i32, %c0_i32_0 : i32, i32
  }
  func.func @transform_4(%arg0: i32, %arg1: i32) -> (i32, i32, i32) {
    %c0_i32 = arith.constant 0 : i32
    %c0_i32_0 = arith.constant 0 : i32
    return %arg0, %c0_i32, %arg1 : i32, i32, i32
  }
}

</mosaic_0001>

<bundles_post_ra>
// kernel: a_call__.1
= control target key start
LH: loop header
LB: loop body
LE: loop exit
PB: predicated region body
PF: predicated region fallthrough
CT: control target
= control target key end

     0   :  { %s431_s15 = smov 0   ;;  %s433_s16 = smov 0   ;;  %s473_s0 = inlined_call_operand.vmem [shape: f32[2,4,64], index: 0, kind: input, shape index: {}]   ;;  %s474_s1 = inlined_call_operand.vmem [shape: f32[8,4], index: 1, kind: input, shape index: {}]   ;;  %s475_s2 = inlined_call_operand.vmem [shape: f32[8,1], index: 2, kind: input, shape index: {}]   ;;  %s476_s3 = inlined_call_operand.vmem [shape: f32[8,1], index: 3, kind: input, shape index: {}]   ;;  %s477_s4 = inlined_call_operand.vmem [shape: f32[2,8,64], index: 4, kind: output, shape index: {}]  }
   0x1   :  { %s435_s17 = smov 0  }
   0x2 LB: > { %s26_s18 = sadd.s32 1, %s399_s16  ;;  %p348_p0 = scmp.ge.s32.totalorder %s403_s17, 1  ;;  %s403_s17 = sphi %s435_s17, %s14_s17   ;;  %s399_s16 = sphi %s433_s16, %s479_s16   ;;  %s395_s15 = sphi %s431_s15, %s478_s15  }
   0x3   : > { %p28_p1 = scmp.ge.s32.totalorder %s26_s18, 2  ;;  %p180_p2 = scmp.lt.s32.totalorder %s403_s17, 3 }
   0x5   : > { %s481_s18 = smov (%p28_p1, %s26_s18), 0  ;;  %p181_p3 = pnand %p348_p0, %p180_p2 }
   0x6   : > { %p210_p4 = scmp.lt.s32.totalorder (!%p181_p3), %s395_s15, 1 }
   0x7   : > { %184 = sbr.rel (%p181_p3) target bundleno = 148 (0x94), region = 36 }
   0xc   : > { %v254_v0 = vld [vmem:[%s475_s2] sm:$0xff]  ;;  %v405_v1 = vmov 0   ;;  %s483_s15 = smov (!%p210_p4, %s395_s15), 1  ;;  %vm230_vm0 = vcmask 1043456   ;;  %vm226_vm1 = vcmask 31744   ;;  %vm268_vm2 = vcmask 523264  }
   0xd   : > { %380 = vset.pattern.permute.xlu0 %v405_v1  ;;  %s349_s21 = sshll.u32 %s483_s15, 2  ;;  %v224_v2 = vld [vmem:[%s474_s1] sm:$0xff]  ;;  %s350_s29 = sshll.u32 %s483_s15, 3 }
   0xe   : > { %257 = vperm.xlu0 %380, %v254_v0   ;;  %s216_s24 = scalar_lea.vmem %s473_s0, %s349_s21  ;;  %v261_v4 = vld [vmem:[%s476_s3] sm:$0xff]  ;;  %s223_s6 = scalar_lea.vmem %s477_s4, %s350_s29 }
   0xf   : > { %v225_v3 = vld [vmem:[%s216_s24] sm:$0xf] }
  0x10   : > { %351 = vmatpush.msk.msra.mxu0 %vm230_vm0, %v225_v3 }
  0x11   : > { %352 = vmatmul.msk.f32.vlgmr.msra.gmra.mxu0 %vm226_vm1, %v224_v2 }
  0x16   : > { %264 = vperm.xlu0 %380, %v261_v4  }
  0x80   : > { %v258_v5 = vpop.permute.xlu0 %257 }
  0x88   : > { %v265_v8 = vpop.permute.xlu0 %264 }
  0x8e   : > { %v251_v6 = vpop.f32.mrf.mxu0 }
  0x8f   : > { %v260_v7 = vmul.f32 %v258_v5, %v251_v6 }
  0x91   : > { %v267_v9 = vadd.f32 %v265_v8, %v260_v7 }
  0x93   : > { %269 = vst.msk [vmem:[%s223_s6] sm:$0xff] %vm268_vm2, %v267_v9 }
  0x94 PF: > { %s14_s17 = sadd.s32 1, %s403_s17   ;;  %s478_s15 = smov %s399_s16 }
  0x95   : > { %p11_p5 = scmp.ge.s32.totalorder %s14_s17, 4   ;;  %s479_s16 = smov %s481_s18 }
  0x97   :  { %13 = sbr.rel (!%p11_p5) target bundleno = 2 (0x2), region = 66 }

</bundles_post_ra>
